<compile_context>
chip_gen: v5e
topology: v5e:2x2
jax: 0.10.0
libtpu: 0.0.40
codegen_flags: <defaults>
</compile_context>

<pallas_src>
import jax
import jax.numpy as jnp
from jax.experimental import pallas as pl
from jax.experimental.pallas import tpu as pltpu


def _cdiv(a, b):
    return (a + b - 1) // b


def _round_up(x, m):
    return ((x + m - 1) // m) * m


def _round_down(x, m):
    return (x // m) * m


def _linear_tanh_kernel(x_ref, w_ref, b_ref, o_ref):
    # x_ref: (tm, I) ; w_ref: (I, tn) ; b_ref: (1, tn) ; o_ref: (tm, tn)
    y = jnp.dot(x_ref[...], w_ref[...], preferred_element_type=jnp.float32)
    o_ref[...] = jnp.tanh(y + b_ref[...].astype(jnp.float32)).astype(o_ref.dtype)


def make_linear_encoder_fn(block_m=1024, block_e=512, compute_dtype=None,
                           vmem_budget_bytes=48 << 20):
    """Returns apply(params, sequences, ignored_state, return_all_hidden_states).

    params = {"w_t": (size_before_enc, enc_size), "b": (enc_size,)}.
    The weight is stored pre-transposed relative to torch's (out, in) layout so
    no per-call transpose (extra HBM pass) is needed.
    """

    def _build_and_call(x2d, wT, bias2d, tm, tn, m_tiles, n_tiles, out_dtype,
                        vmem_limit, cost, single_buffer_weights):
        M, I = x2d.shape
        E_pad = wT.shape[1]

        x_spec = pl.BlockSpec((tm, I), lambda i, j: (i, 0))
        o_spec = pl.BlockSpec((tm, tn), lambda i, j: (i, j))
        if n_tiles == 1 and single_buffer_weights:
            # Constant index_map -> the block is never re-fetched, so a single
            # buffer suffices (halves the resident weight footprint on v7x).
            try:
                w_spec = pl.BlockSpec((I, tn), lambda i, j: (0, 0),
                                      pipeline_mode=pl.Buffered(1))
                b_spec = pl.BlockSpec((1, tn), lambda i, j: (0, 0),
                                      pipeline_mode=pl.Buffered(1))
            except TypeError:
                w_spec = pl.BlockSpec((I, tn), lambda i, j: (0, 0))
                b_spec = pl.BlockSpec((1, tn), lambda i, j: (0, 0))
        else:
            w_spec = pl.BlockSpec((I, tn), lambda i, j: (0, j))
            b_spec = pl.BlockSpec((1, tn), lambda i, j: (0, j))

        return pl.pallas_call(
            _linear_tanh_kernel,
            out_shape=jax.ShapeDtypeStruct((M, E_pad), out_dtype),
            grid_spec=pltpu.PrefetchScalarGridSpec(
                num_scalar_prefetch=0,
                grid=(m_tiles, n_tiles),
                in_specs=[x_spec, w_spec, b_spec],
                out_specs=o_spec,
            ),
            compiler_params=pltpu.CompilerParams(
                dimension_semantics=("parallel", "parallel"),
                vmem_limit_bytes=vmem_limit),
            cost_estimate=cost,
        )(x2d, wT, bias2d)

    def apply(params, sequences, ignored_state, return_all_hidden_states=False):
        T, B, I = sequences.shape
        wT = params["w_t"]                       # (I, E), pre-transposed
        bias = params["b"]                       # (E,)
        E = wT.shape[1]
        out_dtype = sequences.dtype

        in_dtype = jnp.dtype(compute_dtype) if compute_dtype is not None \
            else jnp.dtype(sequences.dtype)
        row_align = 16 if in_dtype == jnp.dtype(jnp.bfloat16) else 8

        # Lane-dense output: pad only the (tiny) weight columns and bias.
        E_pad = _round_up(E, 128)
        if E_pad != E:
            wT = jnp.pad(wT, ((0, 0), (0, E_pad - E)))
            bias = jnp.pad(bias, (0, E_pad - E))
        bias2d = bias.reshape(1, E_pad).astype(jnp.float32)
        if wT.dtype != in_dtype:
            wT = wT.astype(in_dtype)

        # Flatten time x batch into one GEMM; no host-side row padding.
        M = T * B
        x2d = sequences.reshape(M, I)
        if x2d.dtype != in_dtype:
            x2d = x2d.astype(in_dtype)

        # Tile sizes from an explicit VMEM budget (conservative for v7x 64 MiB).
        tn = min(_round_up(min(block_e, E_pad), 128), E_pad)
        n_tiles = _cdiv(E_pad, tn)
        w_bufs = 1 if n_tiles == 1 else 2
        xb = jnp.dtype(in_dtype).itemsize
        ob = jnp.dtype(out_dtype).itemsize
        fixed = w_bufs * (I * tn * xb + tn * 4)
        per_row = 2 * (I * xb + tn * ob)          # double-buffered x + out tiles
        tm_cap = max((vmem_budget_bytes - fixed) // max(per_row, 1), row_align)
        # Aim for >= 2 row tiles so the "parallel" axis shards over v7x's 2 TCs.
        tm = min(block_m, int(tm_cap), _round_up(_cdiv(M, 2), row_align))
        tm = max(_round_down(tm, row_align), row_align)
        m_tiles = _cdiv(M, tm)

        vmem_limit = min(int(1.5 * (fixed + per_row * tm)) + (8 << 20), 96 << 20)
        cost = pl.CostEstimate(
            flops=2 * M * I * E_pad,
            transcendentals=M * E_pad,
            bytes_accessed=M * I * xb + I * E_pad * xb + M * E_pad * ob)

        try:
            out = _build_and_call(x2d, wT, bias2d, tm, tn, m_tiles, n_tiles,
                                  out_dtype, vmem_limit, cost, True)
        except Exception:  # pragma: no cover - fallback if Buffered(1) rejected
            out = _build_and_call(x2d, wT, bias2d, tm, tn, m_tiles, n_tiles,
                                  out_dtype, vmem_limit, cost, False)

        encoded = (out[:, :E] if E_pad != E else out).reshape(T, B, E)

        # State handling exactly as in the PyTorch module (pure metadata).
        st = jnp.tile(ignored_state, (T, 1, 1)) if return_all_hidden_states \
            else ignored_state
        return encoded, st

    return apply


def init_params(key, size_before_enc, enc_size, dtype=jnp.float32):
    """Weight kept pre-transposed: w_t = W.T with W in torch's (out, in) layout."""
    kw, kb = jax.random.split(key)
    w = jax.random.normal(kw, (enc_size, size_before_enc), dtype) * 0.1
    b = jax.random.normal(kb, (enc_size,), dtype) * 0.1
    return {"w_t": w.T, "b": b}


if __name__ == "__main__":
    # Small shapes consistent with the module's forward: time-major sequences.
    size_before_enc = 16
    enc_size = 32
    T, B = 8, 2

    key = jax.random.PRNGKey(0)
    kp, ks, kh = jax.random.split(key, 3)
    params = init_params(kp, size_before_enc, enc_size)
    sequences = jax.random.normal(ks, (T, B, size_before_enc), jnp.float32)
    ignored_state = jax.random.normal(kh, (1, B, enc_size), jnp.float32)

    # f32 datapath (bit-accurate vs. reference).
    apply_f32 = make_linear_encoder_fn()
    encoded, st = apply_f32(params, sequences, ignored_state,
                            return_all_hidden_states=False)
    encoded_all, st_all = apply_f32(params, sequences, ignored_state,
                                    return_all_hidden_states=True)

    # bf16 compute path (f32 MXU accumulation; half the streaming HBM traffic).
    apply_bf16 = make_linear_encoder_fn(compute_dtype=jnp.bfloat16)
    encoded_bf16, _ = apply_bf16(params, sequences, ignored_state,
                                 return_all_hidden_states=False)

    jax.block_until_ready((encoded, st, encoded_all, st_all, encoded_bf16))

    # Pure-JAX reference check.
    ref = jnp.tanh(jnp.einsum("tbi,ie->tbe", sequences, params["w_t"]) + params["b"])
    assert encoded.shape == (T, B, enc_size), encoded.shape
    assert encoded_all.shape == (T, B, enc_size), encoded_all.shape
    assert st.shape == (1, B, enc_size), st.shape
    assert st_all.shape == (T, B, enc_size), st_all.shape
    assert bool(jnp.allclose(encoded, ref, atol=1e-5, rtol=1e-5))
    assert bool(jnp.allclose(encoded_all, ref, atol=1e-5, rtol=1e-5))
    assert bool(jnp.allclose(encoded_bf16, ref, atol=3e-2, rtol=3e-2))
    assert bool(jnp.allclose(st, ignored_state))
    assert bool(jnp.allclose(st_all, jnp.tile(ignored_state, (T, 1, 1))))
    assert not bool(jnp.isnan(encoded).any())

    print("KERNEL_OK")
</pallas_src>

<mosaic_0001>
module attributes {stable_mosaic.version = 11 : i64} {
  func.func @_linear_tanh_kernel(%arg0: i32, %arg1: i32, %arg2: memref<8x16xf32, #tpu.memory_space<vmem>>, %arg3: memref<16x128xf32, #tpu.memory_space<vmem>>, %arg4: memref<1x128xf32, #tpu.memory_space<vmem>>, %arg5: memref<8x128xf32, #tpu.memory_space<vmem>>) attributes {dimension_semantics = [#tpu.dimension_semantics<parallel>, #tpu.dimension_semantics<parallel>], iteration_bounds = array<i64: 2, 1>, scalar_prefetch = 0 : i64, scratch_operands = 0 : i64, tpu.core_type = #tpu.core_type<tc>, window_params = [{transform_indices = @transform_0, window_bounds = array<i64: 8, 16>}, {pipeline_mode = #tpu.pipeline_mode<synchronous>, transform_indices = @transform_1, window_bounds = array<i64: 16, 128>}, {pipeline_mode = #tpu.pipeline_mode<synchronous>, transform_indices = @transform_2, window_bounds = array<i64: 1, 128>}, {transform_indices = @transform_3, window_bounds = array<i64: 8, 128>}]} {
    %c0 = arith.constant 0 : index
    %c0_0 = arith.constant 0 : index
    %0 = vector.load %arg2[%c0, %c0_0] : memref<8x16xf32, #tpu.memory_space<vmem>>, vector<8x16xf32>
    %c0_1 = arith.constant 0 : index
    %c0_2 = arith.constant 0 : index
    %1 = vector.load %arg3[%c0_1, %c0_2] : memref<16x128xf32, #tpu.memory_space<vmem>>, vector<16x128xf32>
    %cst = arith.constant dense<0.000000e+00> : vector<8x128xf32>
    %2 = tpu.matmul %0, %1, %cst {dimension_numbers = #tpu.dot_dimension_numbers<[1], [0], [0], [1], [0, 0, 1, 1], [], []>} : vector<8x16xf32>, vector<16x128xf32>, vector<8x128xf32> -> vector<8x128xf32>
    %c0_3 = arith.constant 0 : index
    %c0_4 = arith.constant 0 : index
    %3 = vector.load %arg4[%c0_3, %c0_4] : memref<1x128xf32, #tpu.memory_space<vmem>>, vector<1x128xf32>
    %4 = vector.broadcast %3 : vector<1x128xf32> to vector<8x128xf32>
    %5 = arith.addf %2, %4 : vector<8x128xf32>
    %6 = math.tanh %5 : vector<8x128xf32>
    %c0_5 = arith.constant 0 : index
    %c0_6 = arith.constant 0 : index
    %7 = vector.load %arg5[%c0_5, %c0_6] : memref<8x128xf32, #tpu.memory_space<vmem>>, vector<8x128xf32>
    tpu.vector_store %arg5[%c0_5, %c0_6], %6 {strides = array<i32>} : memref<8x128xf32, #tpu.memory_space<vmem>>, vector<8x128xf32>,
    return
  }
  func.func @transform_0(%arg0: i32, %arg1: i32) -> (i32, i32) {
    %c0_i32 = arith.constant 0 : i32
    %c0_i32_0 = arith.constant 0 : i32
    return %arg0, %c0_i32 : i32, i32
  }
  func.func @transform_1(%arg0: i32, %arg1: i32) -> (i32, i32) {
    %c0_i32 = arith.constant 0 : i32
    %c0_i32_0 = arith.constant 0 : i32
    %c0_i32_1 = arith.constant 0 : i32
    return %c0_i32, %c0_i32_0 : i32, i32
  }
  func.func @transform_2(%arg0: i32, %arg1: i32) -> (i32, i32) {
    %c0_i32 = arith.constant 0 : i32
    %c0_i32_0 = arith.constant 0 : i32
    %c0_i32_1 = arith.constant 0 : i32
    return %c0_i32, %c0_i32_0 : i32, i32
  }
  func.func @transform_3(%arg0: i32, %arg1: i32) -> (i32, i32) {
    %c0_i32 = arith.constant 0 : i32
    return %arg0, %arg1 : i32, i32
  }
}

module attributes {stable_mosaic.version = 11 : i64} {
  func.func @_linear_tanh_kernel(%arg0: i32, %arg1: i32, %arg2: memref<8x16xf32, #tpu.memory_space<vmem>>, %arg3: memref<16x128xf32, #tpu.memory_space<vmem>>, %arg4: memref<1x128xf32, #tpu.memory_space<vmem>>, %arg5: memref<8x128xf32, #tpu.memory_space<vmem>>) attributes {dimension_semantics = [#tpu.dimension_semantics<parallel>, #tpu.dimension_semantics<parallel>], iteration_bounds = array<i64: 2, 1>, scalar_prefetch = 0 : i64, scratch_operands = 0 : i64, tpu.core_type = #tpu.core_type<tc>, window_params = [{transform_indices = @transform_0, window_bounds = array<i64: 8, 16>}, {transform_indices = @transform_1, window_bounds = array<i64: 16, 128>}, {transform_indices = @transform_2, window_bounds = array<i64: 1, 128>}, {transform_indices = @transform_3, window_bounds = array<i64: 8, 128>}]} {
    %c0 = arith.constant 0 : index
    %c0_0 = arith.constant 0 : index
    %0 = vector.load %arg2[%c0, %c0_0] : memref<8x16xf32, #tpu.memory_space<vmem>>, vector<8x16xf32>
    %c0_1 = arith.constant 0 : index
    %c0_2 = arith.constant 0 : index
    %1 = vector.load %arg3[%c0_1, %c0_2] : memref<16x128xf32, #tpu.memory_space<vmem>>, vector<16x128xf32>
    %cst = arith.constant dense<0.000000e+00> : vector<8x128xf32>
    %2 = tpu.matmul %0, %1, %cst {dimension_numbers = #tpu.dot_dimension_numbers<[1], [0], [0], [1], [0, 0, 1, 1], [], []>} : vector<8x16xf32>, vector<16x128xf32>, vector<8x128xf32> -> vector<8x128xf32>
    %c0_3 = arith.constant 0 : index
    %c0_4 = arith.constant 0 : index
    %3 = vector.load %arg4[%c0_3, %c0_4] : memref<1x128xf32, #tpu.memory_space<vmem>>, vector<1x128xf32>
    %4 = vector.broadcast %3 : vector<1x128xf32> to vector<8x128xf32>
    %5 = arith.addf %2, %4 : vector<8x128xf32>
    %6 = math.tanh %5 : vector<8x128xf32>
    %c0_5 = arith.constant 0 : index
    %c0_6 = arith.constant 0 : index
    %7 = vector.load %arg5[%c0_5, %c0_6] : memref<8x128xf32, #tpu.memory_space<vmem>>, vector<8x128xf32>
    tpu.vector_store %arg5[%c0_5, %c0_6], %6 {strides = array<i32>} : memref<8x128xf32, #tpu.memory_space<vmem>>, vector<8x128xf32>,
    return
  }
  func.func @transform_0(%arg0: i32, %arg1: i32) -> (i32, i32) {
    %c0_i32 = arith.constant 0 : i32
    %c0_i32_0 = arith.constant 0 : i32
    return %arg0, %c0_i32 : i32, i32
  }
  func.func @transform_1(%arg0: i32, %arg1: i32) -> (i32, i32) {
    %c0_i32 = arith.constant 0 : i32
    %c0_i32_0 = arith.constant 0 : i32
    return %c0_i32, %arg1 : i32, i32
  }
  func.func @transform_2(%arg0: i32, %arg1: i32) -> (i32, i32) {
    %c0_i32 = arith.constant 0 : i32
    %c0_i32_0 = arith.constant 0 : i32
    return %c0_i32, %arg1 : i32, i32
  }
  func.func @transform_3(%arg0: i32, %arg1: i32) -> (i32, i32) {
    %c0_i32 = arith.constant 0 : i32
    return %arg0, %arg1 : i32, i32
  }
}

</mosaic_0001>

<bundles_post_ra>
// kernel: tpu_custom_call.1
= control target key start
LH: loop header
LB: loop body
LE: loop exit
PB: predicated region body
PF: predicated region fallthrough
CT: control target
= control target key end

     0   :  { %8 = vsyncpa [#allocation3], 0  ;;  %s769_s0 = inlined_call_operand.hbm [shape: f32[16,16], index: 0, kind: input, shape index: {}]   ;;  %s770_s1 = inlined_call_operand.hbm [shape: f32[16,128], index: 1, kind: input, shape index: {}]   ;;  %s771_s2 = inlined_call_operand.vmem [shape: f32[1,128], index: 2, kind: input, shape index: {}]   ;;  %s772_s3 = inlined_call_operand.hbm [shape: f32[16,128], index: 3, kind: output, shape index: {}]  }
   0x1   :  { %10 = vsyncpa [#allocation3 + $0x1], 0 }
   0x2   :  { %11 = vsyncpa [#allocation6], 0 }
   0x3   :  { %12 = vsyncpa [#allocation4], 0 }
   0x4   :  { %14 = vsyncpa [#allocation4 + $0x1], 0  ;;  %s623_s12 = smov 0   ;;  %s625_s13 = smov 0  }
   0x5   :  { %s627_s14 = smov 0   ;;  %s629_s15 = smov 0  }
   0x6   :  { %s631_s16 = smov 0   ;;  %s633_s17 = smov 0  }
   0x7 LB: > { %s358_s18 = sadd.s32 4294967295, %s598_s17   ;;  %p360_p0 = scmp.ge.s32.totalorder %s598_s17, 1  ;;  %s598_s17 = sphi %s633_s17, %s20_s17   ;;  %s594_s16 = sphi %s631_s16, %s783_s16   ;;  %s590_s15 = sphi %s629_s15, %s782_s15   ;;  %s586_s14 = sphi %s627_s14, %s781_s14   ;;  %s582_s13 = sphi %s625_s13, %s780_s13   ;;  %s578_s12 = sphi %s623_s12, %s779_s12  }
   0x8   : > { %p655_p1 = scmp.eq.s32.totalorder %s358_s18, 0  ;;  %p133_p2 = scmp.lt.s32.totalorder %s598_s17, 3 }
   0x9   : > { %s144_s22 = sshll.u32 %s770_s1, 4  ;;  %s600_s24 = smov [#allocation5]   ;;  %s145_s22 = int_to_ptr.hbm [resolvable:$true] %s144_s22 }
   0xa   : > { %p663_p3 = pnand %p360_p0, %p133_p2  ;;  %s146_s25 = sshll.u32 %s600_s24, 4  ;;  %s147_s25 = int_to_ptr.vmem [resolvable:$true] %s146_s25 }
   0xb   : > { %p362_p6 = scmp.ge.s32.totalorder %s598_s17, 2  ;;  %s601_s26 = smov 128  }
   0xc   : > { %p382_p4 = pneg %p663_p3  ;;  %s602_s27 = smov 8  }
   0xd   : > { %s359_s28 = sadd.s32 4294967294, %s598_s17   ;;  %s32_s29 = sadd.s32 1, %s594_s16 }
   0xe   : > { %p383_p5 = pnand %p382_p4, %p655_p1  ;;  %s39_s30 = sadd.s32 1, %s586_s14 }
   0xf   : > { %p34_p7 = scmp.ge.s32.totalorder %s32_s29, 2  ;;  %p46_p8 = scmp.ne.s32.totalorder %s586_s14, %s582_s13 }
  0x10   : > { %385 = dma.hbm_to_vmem [thread:$0]  (!%p383_p5), %s145_s22, 256, %s147_s25, [#allocation6], %s601_s26, %s601_s26, %s602_s27  }
  0x11   : > { %p47_p9 = scmp.eq.s32.totalorder %s598_s17, 0  ;;  %p52_p10 = scmp.ne.s32.totalorder %s582_s13, %s578_s12 }
  0x12   : > { %s785_s29 = smov (%p34_p7, %s32_s29), 0  ;;  %p120_p13 = scmp.eq.s32.totalorder %s358_s18, 1 }
  0x13   : > { %p682_p11 = por %p47_p9, %p46_p8  ;;  %p688_p12 = por %p655_p1, %p52_p10 }
  0x14   : > { %s36_s6 = ssub.s32 %s594_s16, %s785_s29  ;;  %p126_p2 = scmp.eq.s32.totalorder %s359_s28, 1 }
  0x15   : > { %p37_p0 = scmp.eq.s32.totalorder %s36_s6, 0  ;;  %p694_p4 = por %p120_p13, %p46_p8 }
  0x16   : > { %p395_p5 = scmp.lt.s32.totalorder %s598_s17, 2  ;;  %p702_p7 = por %p126_p2, %p52_p10 }
  0x17   : > { %s700_s8 = scalar_select %p37_p0, %s586_s14, %s39_s30  }
  0x18   : > { %s163_s10 = sand.u32 1, %s586_s14   ;;  %s364_s20 = sshll.u32 %s594_s16, 3 }
  0x19   : > { %s363_s11 = sshll.u32 %s163_s10, 3  ;;  %s171_s18 = scalar_lea.hbm %s769_s0, %s364_s20 }
  0x1a   : > { %s167_s24 = scalar_lea.vmem [#allocation2], %s363_s11  ;;  %s173_s26 = sshll.u32 %s171_s18, 4  ;;  %s174_s26 = int_to_ptr.hbm [resolvable:$true] %s173_s26 }
  0x1b   : > { %s175_s25 = sshll.u32 %s167_s24, 4  ;;  %p387_p8 = pnand %p395_p5, %p682_p11  ;;  %s176_s25 = int_to_ptr.vmem [resolvable:$true] %s175_s25 }
  0x1c   : > { %s164_s27 = scalar_lea.sflag [#allocation3], %s163_s10  ;;  %184 = sbr.rel (%p663_p3) target bundleno = 178 (0xb2), region = 32 }
  0x1d   : > { %389 = dma.hbm_to_vmem [thread:$0]  (!%p387_p8), %s174_s26, 128, %s176_s25, %s164_s27  }
  0x1e   : > { %s716_s28 = sand.u32 (!%p663_p3), 1, %s582_s13  }
  0x1f   : > { %s366_s30 = sshll.u32 (!%p663_p3), %s716_s28, 3  ;;  %s187_s6 = scalar_lea.sflag (!%p663_p3), [#allocation3], %s716_s28 }
  0x20   : > { %s190_s11 = scalar_lea.vmem (!%p663_p3), [#allocation2], %s366_s30 }
  0x21   : > { %565 = dma.done.wait (%p688_p12), %s187_s6, 128  }
  0x22   : > { %567 = vsyncadd (%p688_p12), %s187_s6, 4294967168 }
  0x23   : > { %569 = dma.done.wait (%p655_p1), [#allocation6], 256  }
  0x24   : > { %571 = vsyncadd (%p655_p1), [#allocation6], 4294967040  ;;  %v221_v0 = vld [vmem:[#allocation5 + $0x8] sm:$0xff]  ;;  %v220_v1 = vld [vmem:[#allocation5] sm:$0xff]  ;;  %vm226_vm0 = vcmask 130048   ;;  %s371_s5 = sshll.u32 %s590_s15, 3 }
  0x25   : > { %244 = vmatpush.msra.mxu0 %v221_v0  ;;  %v219_v2 = vld [vmem:[%s190_s11] sm:$0xff]  ;;  %s264_s20 = scalar_lea.hbm %s772_s3, %s371_s5  ;;  %s218_s21 = scalar_lea.vmem [#allocation7], %s366_s30 }
  0x26   : > { %v449_v3 = vld [vmem:[%s771_s2] ss:$0 sm:$0xff]  ;;  %s266_s22 = sshll.u32 %s218_s21, 4  ;;  %s268_s18 = sshll.u32 %s264_s20, 4  ;;  %s267_s22 = int_to_ptr.vmem [resolvable:$true] %s266_s22  ;;  %s269_s18 = int_to_ptr.hbm [resolvable:$true] %s268_s18 }
  0x27   : > { %245 = vmatpush.msra.mxu0 %v220_v1  ;;  %s253_s24 = scalar_lea.sflag [#allocation4], %s716_s28  ;;  %s526_s25 = sshra.s32 %s269_s18, 4  ;;  %s527_s25 = int_to_ptr.hbm [resolvable:$true] %s526_s25 }
  0x28   : > { %369 = vmatmul.msk.f32.vlgmr.msra.gmra.mxu0 %vm226_vm0, %v219_v2  ;;  %s528_s26 = scalar_lea.hbm %s527_s25, 8  ;;  %s532_s6 = scalar_lea.hbm %s772_s3, 16 }
  0x29   : > { %p529_p1 = scmp.ne.s32.totalorder %s527_s25, %s528_s26  ;;  %p533_p10 = scmp.lt.s32.totalorder %s527_s25, %s772_s3 }
  0x2a   : > { %p534_p11 = scmp.lt.s32.totalorder %s532_s6, %s528_s26 }
  0x2b   : > { %p530_p3 = pnand %p529_p1, %p694_p4 }
  0x2c   : > { %p535_p12 = por %p534_p11, %p533_p10 }
  0x2d   : > { %p531_p9 = pneg %p530_p3 }
  0x2f   : > { %p536_p13 = pnand %p535_p12, %p531_p9 }
  0xa5   : > { %v247_v4 = vpop.f32.mrf.mxu0 }
  0xa6   : > { %v248_v5 = vadd.f32 %v449_v3, %v247_v4 }
  0xa8   : > { %450 = vtanh.f32 %v248_v5 }
  0xae   : > { %v451_v6 = vpop.eup %450 }
  0xaf   : > { %251 = vst [vmem:[%s218_s21] sm:$0xff] %v451_v6 }
  0xb0   : > { %539 = shalt.err (!%p536_p13)
}
  0xb1   : > { %380 = dma.vmem_to_hbm [thread:$0]  (%p694_p4), %s267_s22, 128, %s269_s18, %s253_s24  }
  0xb2 PF: > { %s280_s28 = sand.u32 1, %s578_s12   ;;  %p391_p0 = pnand %p362_p6, %p702_p7 }
  0xb3   : > { %s281_s23 = scalar_lea.sflag [#allocation4], %s280_s28 }
  0xb4   : > { %p392_p2 = pneg %p391_p0 }
  0xb6   : > { %573 = dma.done.wait (%p392_p2), %s281_s23, 128  }
  0xb7   : > { %575 = vsyncadd (%p392_p2), %s281_s23, 4294967168  ;;  %s20_s17 = sadd.s32 1, %s598_s17   ;;  %s779_s12 = smov %s582_s13 }
  0xb8   : > { %p17_p5 = scmp.ge.s32.totalorder %s20_s17, 4   ;;  %s780_s13 = smov %s586_s14 }
  0xb9   : > { %s781_s14 = smov %s700_s8  ;;  %s782_s15 = smov %s594_s16 }
  0xba   : > { %s783_s16 = smov %s785_s29  ;;  %19 = sbr.rel (!%p17_p5) target bundleno = 7 (0x7), region = 81 }
  0xbf   :  { %287 = vsyncpa [#allocation3], 1 }
  0xc0   :  { %289 = vsyncpa [#allocation3 + $0x1], 1 }
  0xc1   :  { %290 = vsyncpa [#allocation6], 1 }
  0xc2   :  { %291 = vsyncpa [#allocation4], 1 }
  0xc3   :  { %293 = vsyncpa [#allocation4 + $0x1], 1 }

// kernel: tpu_custom_call.1
= control target key start
LH: loop header
LB: loop body
LE: loop exit
PB: predicated region body
PF: predicated region fallthrough
CT: control target
= control target key end

     0   :  { %8 = vsyncpa [#allocation3], 0  ;;  %s805_s0 = inlined_call_operand.hbm [shape: f32[16,16], index: 0, kind: input, shape index: {}]   ;;  %s806_s1 = inlined_call_operand.hbm [shape: f32[16,128], index: 1, kind: input, shape index: {}]   ;;  %s807_s2 = inlined_call_operand.vmem [shape: f32[1,128], index: 2, kind: input, shape index: {}]   ;;  %s808_s3 = inlined_call_operand.hbm [shape: f32[16,128], index: 3, kind: output, shape index: {}]  }
   0x1   :  { %10 = vsyncpa [#allocation3 + $0x1], 0 }
   0x2   :  { %11 = vsyncpa [#allocation6], 0 }
   0x3   :  { %12 = vsyncpa [#allocation4], 0 }
   0x4   :  { %14 = vsyncpa [#allocation4 + $0x1], 0  ;;  %s659_s12 = smov 0   ;;  %s661_s13 = smov 0  }
   0x5   :  { %s663_s14 = smov 0   ;;  %s665_s15 = smov 0  }
   0x6   :  { %s667_s16 = smov 0   ;;  %s669_s17 = smov 0  }
   0x7 LB: > { %s393_s18 = sadd.s32 4294967295, %s634_s17   ;;  %p395_p0 = scmp.ge.s32.totalorder %s634_s17, 1  ;;  %s634_s17 = sphi %s669_s17, %s20_s17   ;;  %s630_s16 = sphi %s667_s16, %s819_s16   ;;  %s626_s15 = sphi %s665_s15, %s818_s15   ;;  %s622_s14 = sphi %s663_s14, %s817_s14   ;;  %s618_s13 = sphi %s661_s13, %s816_s13   ;;  %s614_s12 = sphi %s659_s12, %s815_s12  }
   0x8   : > { %p691_p1 = scmp.eq.s32.totalorder %s393_s18, 0  ;;  %p143_p2 = scmp.lt.s32.totalorder %s634_s17, 3 }
   0x9   : > { %s156_s22 = sshll.u32 %s806_s1, 4  ;;  %s636_s24 = smov [#allocation5]   ;;  %s157_s22 = int_to_ptr.hbm [resolvable:$true] %s156_s22 }
   0xa   : > { %p699_p3 = pnand %p395_p0, %p143_p2  ;;  %s158_s25 = sshll.u32 %s636_s24, 4  ;;  %s159_s25 = int_to_ptr.vmem [resolvable:$true] %s158_s25 }
   0xb   : > { %p398_p6 = scmp.ge.s32.totalorder %s634_s17, 2  ;;  %s637_s26 = smov 128  }
   0xc   : > { %p418_p4 = pneg %p699_p3  ;;  %s638_s27 = smov 8  }
   0xd   : > { %s394_s28 = sadd.s32 4294967294, %s634_s17   ;;  %s32_s29 = sadd.s32 1, %s630_s16 }
   0xe   : > { %p419_p5 = pnand %p418_p4, %p691_p1  ;;  %s39_s30 = sadd.s32 1, %s622_s14 }
   0xf   : > { %p34_p7 = scmp.ge.s32.totalorder %s32_s29, 2  ;;  %p46_p8 = scmp.ne.s32.totalorder %s622_s14, %s618_s13 }
  0x10   : > { %421 = dma.hbm_to_vmem [thread:$0]  (!%p419_p5), %s157_s22, 256, %s159_s25, [#allocation6], %s637_s26, %s637_s26, %s638_s27  }
  0x11   : > { %p47_p9 = scmp.eq.s32.totalorder %s634_s17, 0  ;;  %p52_p10 = scmp.ne.s32.totalorder %s618_s13, %s614_s12 }
  0x12   : > { %s821_s29 = smov (%p34_p7, %s32_s29), 0  ;;  %p130_p13 = scmp.eq.s32.totalorder %s393_s18, 1 }
  0x13   : > { %p718_p11 = por %p47_p9, %p46_p8  ;;  %p724_p12 = por %p691_p1, %p52_p10 }
  0x14   : > { %s36_s6 = ssub.s32 %s630_s16, %s821_s29  ;;  %p136_p2 = scmp.eq.s32.totalorder %s394_s28, 1 }
  0x15   : > { %p37_p0 = scmp.eq.s32.totalorder %s36_s6, 0  ;;  %p730_p4 = por %p130_p13, %p46_p8 }
  0x16   : > { %p431_p5 = scmp.lt.s32.totalorder %s634_s17, 2  ;;  %p738_p7 = por %p136_p2, %p52_p10 }
  0x17   : > { %s736_s8 = scalar_select %p37_p0, %s622_s14, %s39_s30  }
  0x18   : > { %s178_s10 = sand.u32 1, %s622_s14   ;;  %s400_s20 = sshll.u32 %s630_s16, 3 }
  0x19   : > { %s399_s11 = sshll.u32 %s178_s10, 3  ;;  %s186_s18 = scalar_lea.hbm %s805_s0, %s400_s20 }
  0x1a   : > { %s182_s24 = scalar_lea.vmem [#allocation2], %s399_s11  ;;  %s188_s26 = sshll.u32 %s186_s18, 4  ;;  %s189_s26 = int_to_ptr.hbm [resolvable:$true] %s188_s26 }
  0x1b   : > { %s190_s25 = sshll.u32 %s182_s24, 4  ;;  %p423_p8 = pnand %p431_p5, %p718_p11  ;;  %s191_s25 = int_to_ptr.vmem [resolvable:$true] %s190_s25 }
  0x1c   : > { %s179_s27 = scalar_lea.sflag [#allocation3], %s178_s10  ;;  %199 = sbr.rel (%p699_p3) target bundleno = 178 (0xb2), region = 32 }
  0x1d   : > { %425 = dma.hbm_to_vmem [thread:$0]  (!%p423_p8), %s189_s26, 128, %s191_s25, %s179_s27  }
  0x1e   : > { %s752_s28 = sand.u32 (!%p699_p3), 1, %s618_s13  }
  0x1f   : > { %s402_s30 = sshll.u32 (!%p699_p3), %s752_s28, 3  ;;  %s202_s6 = scalar_lea.sflag (!%p699_p3), [#allocation3], %s752_s28 }
  0x20   : > { %s205_s11 = scalar_lea.vmem (!%p699_p3), [#allocation2], %s402_s30 }
  0x21   : > { %601 = dma.done.wait (%p724_p12), %s202_s6, 128  }
  0x22   : > { %603 = vsyncadd (%p724_p12), %s202_s6, 4294967168 }
  0x23   : > { %605 = dma.done.wait (%p691_p1), [#allocation6], 256  }
  0x24   : > { %607 = vsyncadd (%p691_p1), [#allocation6], 4294967040  ;;  %v242_v0 = vld [vmem:[#allocation5 + $0x8] sm:$0xff]  ;;  %v241_v1 = vld [vmem:[#allocation5] sm:$0xff]  ;;  %vm247_vm0 = vcmask 130048   ;;  %s407_s5 = sshll.u32 %s626_s15, 3 }
  0x25   : > { %265 = vmatpush.msra.mxu0 %v242_v0  ;;  %v240_v2 = vld [vmem:[%s205_s11] sm:$0xff]  ;;  %s285_s20 = scalar_lea.hbm %s808_s3, %s407_s5  ;;  %s236_s21 = scalar_lea.vmem [#allocation7], %s402_s30 }
  0x26   : > { %v485_v3 = vld [vmem:[%s807_s2] ss:$0 sm:$0xff]  ;;  %s287_s22 = sshll.u32 %s236_s21, 4  ;;  %s289_s18 = sshll.u32 %s285_s20, 4  ;;  %s288_s22 = int_to_ptr.vmem [resolvable:$true] %s287_s22  ;;  %s290_s18 = int_to_ptr.hbm [resolvable:$true] %s289_s18 }
  0x27   : > { %266 = vmatpush.msra.mxu0 %v241_v1  ;;  %s274_s24 = scalar_lea.sflag [#allocation4], %s752_s28  ;;  %s562_s25 = sshra.s32 %s290_s18, 4  ;;  %s563_s25 = int_to_ptr.hbm [resolvable:$true] %s562_s25 }
  0x28   : > { %405 = vmatmul.msk.f32.vlgmr.msra.gmra.mxu0 %vm247_vm0, %v240_v2  ;;  %s564_s26 = scalar_lea.hbm %s563_s25, 8  ;;  %s568_s6 = scalar_lea.hbm %s808_s3, 16 }
  0x29   : > { %p565_p1 = scmp.ne.s32.totalorder %s563_s25, %s564_s26  ;;  %p569_p10 = scmp.lt.s32.totalorder %s563_s25, %s808_s3 }
  0x2a   : > { %p570_p11 = scmp.lt.s32.totalorder %s568_s6, %s564_s26 }
  0x2b   : > { %p566_p3 = pnand %p565_p1, %p730_p4 }
  0x2c   : > { %p571_p12 = por %p570_p11, %p569_p10 }
  0x2d   : > { %p567_p9 = pneg %p566_p3 }
  0x2f   : > { %p572_p13 = pnand %p571_p12, %p567_p9 }
  0xa5   : > { %v268_v4 = vpop.f32.mrf.mxu0 }
  0xa6   : > { %v269_v5 = vadd.f32 %v485_v3, %v268_v4 }
  0xa8   : > { %486 = vtanh.f32 %v269_v5 }
  0xae   : > { %v487_v6 = vpop.eup %486 }
  0xaf   : > { %272 = vst [vmem:[%s236_s21] sm:$0xff] %v487_v6 }
  0xb0   : > { %575 = shalt.err (!%p572_p13)
}
  0xb1   : > { %416 = dma.vmem_to_hbm [thread:$0]  (%p730_p4), %s288_s22, 128, %s290_s18, %s274_s24  }
  0xb2 PF: > { %s301_s28 = sand.u32 1, %s614_s12   ;;  %p427_p0 = pnand %p398_p6, %p738_p7 }
  0xb3   : > { %s302_s23 = scalar_lea.sflag [#allocation4], %s301_s28 }
  0xb4   : > { %p428_p2 = pneg %p427_p0 }
  0xb6   : > { %609 = dma.done.wait (%p428_p2), %s302_s23, 128  }
  0xb7   : > { %611 = vsyncadd (%p428_p2), %s302_s23, 4294967168  ;;  %s20_s17 = sadd.s32 1, %s634_s17   ;;  %s815_s12 = smov %s618_s13 }
  0xb8   : > { %p17_p5 = scmp.ge.s32.totalorder %s20_s17, 4   ;;  %s816_s13 = smov %s622_s14 }
  0xb9   : > { %s817_s14 = smov %s736_s8  ;;  %s818_s15 = smov %s630_s16 }
  0xba   : > { %s819_s16 = smov %s821_s29  ;;  %19 = sbr.rel (!%p17_p5) target bundleno = 7 (0x7), region = 85 }
  0xbf   :  { %308 = vsyncpa [#allocation3], 1 }
  0xc0   :  { %310 = vsyncpa [#allocation3 + $0x1], 1 }
  0xc1   :  { %311 = vsyncpa [#allocation6], 1 }
  0xc2   :  { %312 = vsyncpa [#allocation4], 1 }
  0xc3   :  { %314 = vsyncpa [#allocation4 + $0x1], 1 }

</bundles_post_ra>
